<compile_context>
chip_gen: v5e
topology: v5e:2x2
jax: 0.10.0
libtpu: 0.0.40
codegen_flags: <defaults>
</compile_context>

<pallas_src>
import jax
import jax.numpy as jnp
from jax.experimental import pallas as pl
from jax.experimental.pallas import tpu as pltpu


def _identity_kernel(x_ref, o_ref):
    # Pure pass-through: copy the VMEM tile of the input into the output tile.
    o_ref[...] = x_ref[...]


def _pick_cols(total: int) -> int:
    """Largest lane-dense width (multiple of 128) that evenly divides `total`."""
    for c in (1024, 512, 256, 128):
        if total % c == 0:
            return c
    # Fallback: single row, full-array block (the (8,128) divisibility rule is
    # waived when the block equals the full array dims).
    return total


def _pick_block_rows(rows: int) -> int:
    """Largest sublane-aligned block height (<=512) that evenly divides `rows`."""
    for r in (512, 256, 128, 64, 32, 16, 8):
        if rows % r == 0:
            return r
    # Fallback: full extent in the row dim (block == array dim -> always legal).
    return rows


def identity(x: jax.Array, *args, skip_pallas_below_bytes: int = 0, **kwargs) -> jax.Array:
    """Pallas implementation of Identity.forward(x, *args, **kwargs) -> x."""
    del args, kwargs  # Identity ignores extra arguments, same as the nn.Module.

    if x.size == 0:
        return x

    # For tiny tensors the pallas_call fixed cost dwarfs the copy; allow a
    # short-circuit (disabled by default so the demo runs the kernel).
    if x.size * x.dtype.itemsize < skip_pallas_below_bytes:
        return x

    orig_shape = x.shape
    orig_dtype = x.dtype
    total = int(x.size)

    # Lane-dense 2D view: cols is a large multiple of 128 when possible.
    cols = _pick_cols(total)
    rows = total // cols
    x2d = x.reshape(rows, cols)

    # Tile rows so the auto-pipeliner can double-buffer; block stays <= 2 MiB
    # for f32 (<= 8 MiB total with in+out double buffering), safe on v7x VMEM.
    block_rows = _pick_block_rows(rows)
    grid = (rows // block_rows,)

    out2d = pl.pallas_call(
        _identity_kernel,
        out_shape=jax.ShapeDtypeStruct((rows, cols), orig_dtype),
        grid=grid,
        in_specs=[pl.BlockSpec((block_rows, cols), lambda i: (i, 0))],
        out_specs=pl.BlockSpec((block_rows, cols), lambda i: (i, 0)),
        # Output aliases the input buffer: with buffer donation this is O(0)
        # extra HBM; without donation XLA keeps the caller's copy valid.
        input_output_aliases={0: 0},
        compiler_params=pltpu.CompilerParams(
            dimension_semantics=("parallel",),
        ),
    )(x2d)

    return out2d.reshape(orig_shape)


if __name__ == "__main__":
    key = jax.random.PRNGKey(0)
    # NCHW input consistent with the generator context: batch=2, channels=4, 16x16.
    x = jax.random.normal(key, (2, 4, 16, 16), dtype=jnp.float32)

    y = identity(x)
    jax.block_until_ready(y)

    assert y.shape == x.shape and y.dtype == x.dtype
    assert bool(jnp.all(y == x))
    print("KERNEL_OK")
</pallas_src>

<mosaic_0001>
module attributes {stable_mosaic.version = 11 : i64} {
  func.func @_identity_kernel(%arg0: i32, %arg1: memref<2x1024xf32, #tpu.memory_space<vmem>>, %arg2: memref<2x1024xf32, #tpu.memory_space<vmem>>) attributes {dimension_semantics = [#tpu.dimension_semantics<parallel>], iteration_bounds = array<i64: 1>, scalar_prefetch = 0 : i64, scratch_operands = 0 : i64, tpu.core_type = #tpu.core_type<tc>, window_params = [{transform_indices = @transform_0, window_bounds = array<i64: 2, 1024>}, {transform_indices = @transform_1, window_bounds = array<i64: 2, 1024>}]} {
    %c0 = arith.constant 0 : index
    %c0_0 = arith.constant 0 : index
    %0 = vector.load %arg1[%c0, %c0_0] : memref<2x1024xf32, #tpu.memory_space<vmem>>, vector<2x1024xf32>
    %c0_1 = arith.constant 0 : index
    %c0_2 = arith.constant 0 : index
    %1 = vector.load %arg2[%c0_1, %c0_2] : memref<2x1024xf32, #tpu.memory_space<vmem>>, vector<2x1024xf32>
    tpu.vector_store %arg2[%c0_1, %c0_2], %0 {strides = array<i32>} : memref<2x1024xf32, #tpu.memory_space<vmem>>, vector<2x1024xf32>,
    return
  }
  func.func @transform_0(%arg0: i32) -> (i32, i32) {
    %c0_i32 = arith.constant 0 : i32
    %c0_i32_0 = arith.constant 0 : i32
    return %arg0, %c0_i32 : i32, i32
  }
  func.func @transform_1(%arg0: i32) -> (i32, i32) {
    %c0_i32 = arith.constant 0 : i32
    %c0_i32_0 = arith.constant 0 : i32
    return %arg0, %c0_i32 : i32, i32
  }
}

</mosaic_0001>

<bundles_post_ra>
// kernel: tpu_custom_call.1
= control target key start
LH: loop header
LB: loop body
LE: loop exit
PB: predicated region body
PF: predicated region fallthrough
CT: control target
= control target key end

     0   :  { %6 = vsyncpa [#allocation3], 0  ;;  %s116_s0 = inlined_call_operand.hbm [shape: f32[2,1024], index: 0, kind: input, shape index: {}, may-alias: {0,1}]   ;;  %s117_s1 = inlined_call_operand.hbm [shape: f32[2,1024], index: 1, kind: output, shape index: {}, may-alias: {0,1}]  }
   0x1   :  { %7 = vsyncpa [#allocation4], 0  ;;  %s13_s8 = sshll.u32 %s116_s0, 4  ;;  %s98_s9 = smov [#allocation2]   ;;  %s14_s8 = int_to_ptr.hbm [resolvable:$true] %s13_s8 }
   0x2   :  { %s15_s10 = sshll.u32 %s98_s9, 4  ;;  %s16_s10 = int_to_ptr.vmem [resolvable:$true] %s15_s10 }
   0x3   :  { %18 = dma.hbm_to_vmem [thread:$0]  %s14_s8, 256, %s16_s10, [#allocation3]  }
   0x4   :  { %94 = dma.done.wait [#allocation3], 256  }
   0x5   :  { %95 = vsyncadd [#allocation3], 4294967040  ;;  %s99_s11 = smov [#allocation5]   ;;  %s34_s15 = sshll.u32 %s117_s1, 4  ;;  %v23_v0 = vld [vmem:[#allocation2] sm:$0xff]  ;;  %v24_v1 = vld [vmem:[#allocation2 + $0x8] sm:$0xff]  ;;  %s35_s15 = int_to_ptr.hbm [resolvable:$true] %s34_s15 }
   0x6   :  { %s32_s12 = sshll.u32 %s99_s11, 4  ;;  %25 = vst [vmem:[#allocation5] sm:$0xff] %v23_v0  ;;  %s33_s12 = int_to_ptr.vmem [resolvable:$true] %s32_s12 }
   0x7   :  { %26 = vst [vmem:[#allocation5 + $0x8] sm:$0xff] %v24_v1 }
   0x8   :  { %37 = dma.vmem_to_hbm [thread:$0]  %s33_s12, 256, %s35_s15, [#allocation4]  }
   0x9   :  { %96 = dma.done.wait [#allocation4], 256  }
   0xa   :  { %97 = vsyncadd [#allocation4], 4294967040 }
   0xb   :  { %42 = vsyncpa [#allocation3], 1 }
   0xc   :  { %43 = vsyncpa [#allocation4], 1 }

</bundles_post_ra>
